<compile_context>
chip_gen: v7x
topology: tpu7x:2x2x1
jax: 0.10.0
libtpu: 0.0.40
codegen_flags: <defaults>
</compile_context>

<pallas_src>
import functools
import math

import jax
import jax.numpy as jnp
from jax import lax
from jax.experimental import pallas as pl
from jax.experimental.pallas import tpu as pltpu


# ---------------------------------------------------------------------------
# Path A: small vocab -> one-hot @ LUT on the MXU (fully vectorized).
# ---------------------------------------------------------------------------
def _embed_onehot_kernel(ids_ref, lut_ref, out_ref, *, scale, vocab):
    """ids_ref: (1, tok_tile, 1) int32 VMEM tile (ids on sublanes)
    lut_ref:  (vocab, d_model) VMEM-resident table
    out_ref:  (tok_tile, d_model) output tile"""
    ids = ids_ref[0]                                   # (tok_tile, 1) int32
    ids = jnp.clip(ids, 0, vocab - 1)                  # OOB guard
    tok_tile = ids.shape[0]
    col = lax.broadcasted_iota(jnp.int32, (tok_tile, vocab), 1)
    one_hot = (ids == col).astype(lut_ref.dtype)       # (tok_tile, vocab)
    acc = jnp.dot(one_hot, lut_ref[...],
                  preferred_element_type=jnp.float32)  # MXU gather
    out_ref[...] = (acc * scale).astype(out_ref.dtype)


# ---------------------------------------------------------------------------
# Path B: larger vocab -> scalar-prefetched ids + per-token VMEM row gather.
# ---------------------------------------------------------------------------
def _embed_gather_kernel(ids_ref, lut_ref, out_ref, *, scale, tok_tile, vocab):
    """ids_ref: SMEM scalar-prefetch ref, (n_pad,) int32 token ids
    lut_ref:  (vocab, d_model) VMEM-resident table
    out_ref:  (tok_tile, d_model) output tile"""
    base = pl.program_id(0) * tok_tile

    def body(t, carry):
        idx = jnp.clip(ids_ref[base + t], 0, vocab - 1)
        row = lut_ref[pl.ds(idx, 1), :]                # (1, d_model) VMEM read
        out_ref[pl.ds(t, 1), :] = row * scale
        return carry

    lax.fori_loop(0, tok_tile, body, 0, unroll=8)


# ---------------------------------------------------------------------------
# Wrappers
# ---------------------------------------------------------------------------
def _vmem_limit(extra_bytes):
    return int(min(100 << 20, max(32 << 20, extra_bytes + (2 << 20))))


def _forward_onehot(ids_flat, lut, scale, tile, n_pad):
    vocab, d_model = lut.shape
    n_tiles = n_pad // tile
    ids3 = ids_flat.reshape(n_tiles, tile, 1)

    itemsize = jnp.dtype(lut.dtype).itemsize
    budget = (vocab * d_model * itemsize            # resident LUT
              + 2 * tile * d_model * itemsize       # double-buffered out tiles
              + 2 * tile * 128 * 4                  # ids tiles (lane-padded)
              + tile * max(vocab, 128) * 4)         # one-hot intermediate

    kernel = functools.partial(_embed_onehot_kernel, scale=scale, vocab=vocab)
    return pl.pallas_call(
        kernel,
        out_shape=jax.ShapeDtypeStruct((n_pad, d_model), lut.dtype),
        grid_spec=pltpu.PrefetchScalarGridSpec(
            num_scalar_prefetch=0,
            grid=(n_tiles,),
            in_specs=[
                pl.BlockSpec((1, tile, 1), lambda i: (i, 0, 0)),
                # Whole LUT, constant block index => DMA'd once, stays in VMEM.
                pl.BlockSpec((vocab, d_model), lambda i: (0, 0)),
            ],
            out_specs=pl.BlockSpec((tile, d_model), lambda i: (i, 0)),
        ),
        compiler_params=pltpu.CompilerParams(
            dimension_semantics=("parallel",),
            vmem_limit_bytes=_vmem_limit(budget),
        ),
    )(ids3, lut)


def _forward_gather(ids_flat, lut, scale, tile, n_pad):
    vocab, d_model = lut.shape
    itemsize = jnp.dtype(lut.dtype).itemsize
    budget = vocab * d_model * itemsize + 4 * tile * d_model * itemsize

    kernel = functools.partial(
        _embed_gather_kernel, scale=scale, tok_tile=tile, vocab=vocab
    )
    return pl.pallas_call(
        kernel,
        out_shape=jax.ShapeDtypeStruct((n_pad, d_model), lut.dtype),
        grid_spec=pltpu.PrefetchScalarGridSpec(
            num_scalar_prefetch=1,          # ids -> SMEM
            grid=(n_pad // tile,),
            in_specs=[
                pl.BlockSpec((vocab, d_model), lambda i, ids: (0, 0)),
            ],
            out_specs=pl.BlockSpec((tile, d_model), lambda i, ids: (i, 0)),
        ),
        compiler_params=pltpu.CompilerParams(
            dimension_semantics=("parallel",),
            vmem_limit_bytes=_vmem_limit(budget),
        ),
    )(ids_flat, lut)


def embeddings_forward(x_ids, lut, *, tok_tile=256, one_hot_max_vocab=512):
    """Pallas equivalent of Embeddings.forward.

    x_ids: (B, S) int32 token indices
    lut:   (vocab, d_model) embedding table
    returns: (B, S, d_model), lut.dtype
    """
    B, S = x_ids.shape
    vocab, d_model = lut.shape
    n_tok = B * S
    scale = math.sqrt(d_model)

    # Token tile: multiple of 8 (sublane-dense output tile), capped by the
    # rounded-up token count so tiny inputs don't over-pad.
    tile = min(tok_tile, ((n_tok + 7) // 8) * 8)
    tile = max(8, (tile // 8) * 8)
    n_pad = pl.cdiv(n_tok, tile) * tile

    ids_flat = x_ids.reshape(n_tok).astype(jnp.int32)
    if n_pad != n_tok:
        ids_flat = jnp.pad(ids_flat, (0, n_pad - n_tok))  # pad with id 0

    if vocab <= one_hot_max_vocab:
        out_flat = _forward_onehot(ids_flat, lut, scale, tile, n_pad)
    else:
        out_flat = _forward_gather(ids_flat, lut, scale, tile, n_pad)

    return out_flat[:n_tok].reshape(B, S, d_model)


if __name__ == "__main__":
    # Small, deterministic setup consistent with the module:
    #   vocab=64, d_model=128 (lane-dense), batch=2, seq=8
    vocab = 64
    d_model = 128
    B, S = 2, 8

    key = jax.random.PRNGKey(0)
    k_lut, k_ids, k_ids2 = jax.random.split(key, 3)

    # nn.Embedding default init is N(0, 1) on the weight.
    lut = jax.random.normal(k_lut, (vocab, d_model), dtype=jnp.float32)
    x_ids = jax.random.randint(k_ids, (B, S), minval=0, maxval=vocab,
                               dtype=jnp.int32)

    scale = math.sqrt(d_model)

    # Case 1: small shapes, one-hot/MXU path.
    out = jax.block_until_ready(embeddings_forward(x_ids, lut))
    ref = jnp.take(lut, x_ids, axis=0) * scale
    assert out.shape == (B, S, d_model)
    assert out.dtype == jnp.float32
    assert jnp.allclose(out, ref, atol=1e-5, rtol=1e-5)

    # Case 2: padding + multi-step grid (n_tok not a multiple of the tile).
    B2, S2 = 4, 100
    x_ids2 = jax.random.randint(k_ids2, (B2, S2), minval=0, maxval=vocab,
                                dtype=jnp.int32)
    out2 = jax.block_until_ready(embeddings_forward(x_ids2, lut))
    ref2 = jnp.take(lut, x_ids2, axis=0) * scale
    assert out2.shape == (B2, S2, d_model)
    assert jnp.allclose(out2, ref2, atol=1e-5, rtol=1e-5)

    # Case 3: force the large-vocab scalar-gather path on the same data.
    out3 = jax.block_until_ready(
        embeddings_forward(x_ids2, lut, one_hot_max_vocab=0))
    assert jnp.allclose(out3, ref2, atol=1e-5, rtol=1e-5)

    print("KERNEL_OK")
</pallas_src>

<mosaic_0001>
module attributes {stable_mosaic.version = 11 : i64} {
  func.func @_embed_onehot_kernel(%arg0: i32, %arg1: memref<1x16x1xi32, #tpu.memory_space<vmem>>, %arg2: memref<64x128xf32, #tpu.memory_space<vmem>>, %arg3: memref<16x128xf32, #tpu.memory_space<vmem>>) attributes {dimension_semantics = [#tpu.dimension_semantics<parallel>], iteration_bounds = array<i64: 1>, scalar_prefetch = 0 : i64, scratch_operands = 0 : i64, tpu.core_type = #tpu.core_type<tc>, window_params = [{transform_indices = @transform_0, window_bounds = array<i64: 1, 16, 1>}, {pipeline_mode = #tpu.pipeline_mode<synchronous>, transform_indices = @transform_1, window_bounds = array<i64: 64, 128>}, {transform_indices = @transform_2, window_bounds = array<i64: 16, 128>}]} {
    %c0 = arith.constant 0 : index
    %c0_0 = arith.constant 0 : index
    %c0_1 = arith.constant 0 : index
    %0 = vector.load %arg1[%c0, %c0_0, %c0_1] : memref<1x16x1xi32, #tpu.memory_space<vmem>>, vector<1x16x1xi32>
    %1 = vector.shape_cast %0 : vector<1x16x1xi32> to vector<16x1xi32>
    %c0_i32 = arith.constant 0 : i32
    %c63_i32 = arith.constant 63 : i32
    %2 = vector.broadcast %c0_i32 : i32 to vector<16x1xi32>
    %3 = arith.maxsi %2, %1 : vector<16x1xi32>
    %4 = vector.broadcast %c63_i32 : i32 to vector<16x1xi32>
    %5 = arith.minsi %4, %3 : vector<16x1xi32>
    %6 = tpu.iota {dimensions = array<i32: 1>} : vector<16x64xi32>
    %7 = vector.broadcast %5 : vector<16x1xi32> to vector<16x64xi32>
    %8 = arith.cmpi eq, %7, %6 : vector<16x64xi32>
    %9 = arith.extui %8 : vector<16x64xi1> to vector<16x64xi32>
    %10 = arith.sitofp %9 : vector<16x64xi32> to vector<16x64xf32>
    %c0_2 = arith.constant 0 : index
    %c0_3 = arith.constant 0 : index
    %11 = vector.load %arg2[%c0_2, %c0_3] : memref<64x128xf32, #tpu.memory_space<vmem>>, vector<64x128xf32>
    %cst = arith.constant dense<0.000000e+00> : vector<16x128xf32>
    %12 = tpu.matmul %10, %11, %cst {dimension_numbers = #tpu.dot_dimension_numbers<[1], [0], [0], [1], [0, 0, 1, 1], [], []>} : vector<16x64xf32>, vector<64x128xf32>, vector<16x128xf32> -> vector<16x128xf32>
    %cst_4 = arith.constant 11.3137083 : f32
    %13 = vector.broadcast %cst_4 : f32 to vector<16x128xf32>
    %14 = arith.mulf %12, %13 : vector<16x128xf32>
    %c0_5 = arith.constant 0 : index
    %c0_6 = arith.constant 0 : index
    %15 = vector.load %arg3[%c0_5, %c0_6] : memref<16x128xf32, #tpu.memory_space<vmem>>, vector<16x128xf32>
    tpu.vector_store %arg3[%c0_5, %c0_6], %14 {strides = array<i32>} : memref<16x128xf32, #tpu.memory_space<vmem>>, vector<16x128xf32>,
    return
  }
  func.func @transform_0(%arg0: i32) -> (i32, i32, i32) {
    %c0_i32 = arith.constant 0 : i32
    %c0_i32_0 = arith.constant 0 : i32
    %c0_i32_1 = arith.constant 0 : i32
    return %arg0, %c0_i32, %c0_i32_0 : i32, i32, i32
  }
  func.func @transform_1(%arg0: i32) -> (i32, i32) {
    %c0_i32 = arith.constant 0 : i32
    %c0_i32_0 = arith.constant 0 : i32
    %c0_i32_1 = arith.constant 0 : i32
    return %c0_i32, %c0_i32_0 : i32, i32
  }
  func.func @transform_2(%arg0: i32) -> (i32, i32) {
    %c0_i32 = arith.constant 0 : i32
    %c0_i32_0 = arith.constant 0 : i32
    return %arg0, %c0_i32 : i32, i32
  }
}

</mosaic_0001>

<bundles_post_ra>
// kernel: tpu_custom_call.1
= control target key start
LH: loop header
LB: loop body
LE: loop exit
PB: predicated region body
PF: predicated region fallthrough
CT: control target
= control target key end

     0   :  { %7 = vsyncpa [#allocation3], 0  ;;  %s322_s0 = inlined_call_operand.vmem [shape: s32[1,16,1], index: 0, kind: input, shape index: {}]   ;;  %s323_s1 = inlined_call_operand.hbm [shape: f32[64,128], index: 1, kind: input, shape index: {}]   ;;  %s324_s2 = inlined_call_operand.hbm [shape: f32[16,128], index: 2, kind: output, shape index: {}]  }
   0x1   :  { %8 = vsyncpa [#allocation4], 0  ;;  %s265_s9 = smov [#allocation2]   ;;  %s217_s13 = scalar_lea.hbm %s323_s1, 1024 }
   0x2   :  { %s16_s10 = sshll.u32 %s265_s9, 4  ;;  %p218_p0 = scmp.ne.s32.totalorder %s323_s1, %s217_s13  ;;  %s17_s10 = int_to_ptr.vmem [resolvable:$true] %s16_s10 }
   0x3   :  { %p221_p1 = scmp.lt.u32.totalorder %s217_s13, %s323_s1 }
   0x5   :  { %p223_p2 = pnand %p221_p1, %p218_p0 }
   0x7   :  { %226 = shalt.err (!%p223_p2)
}
   0x8   :  { %s227_s18 = scalar_lea.vmem %s17_s10, 1024  ;;  %p232_p4 = scmp.lt.s32.totalorder %s17_s10, %s17_s10 }
   0x9   :  { %p228_p3 = scmp.ne.s32.totalorder %s17_s10, %s227_s18  ;;  %p233_p5 = scmp.lt.s32.totalorder %s227_s18, %s227_s18 }
   0xb   :  { %p234_p6 = por %p233_p5, %p232_p4 }
   0xd   :  { %p235_p7 = pnand %p234_p6, %p228_p3 }
   0xf   :  { %238 = shalt.err (!%p235_p7)
}
  0x10   :  { %s266_s19 = smov 128   ;;  %s267_s20 = smov 8  }
  0x11   :  { %22 = dma.hbm_to_vmem [thread:$0]  %s323_s1, 1024, %s17_s10, [#allocation3], %s266_s19, %s266_s19, %s267_s20  }
  0x12   :  { %261 = dma.done.wait [#allocation3], 1024  }
  0x13   :  { %262 = vsyncadd [#allocation3], 4294966272  ;;  %v268_v0 = vmov 0   ;;  %v26_v1 = vld [vmem:[%s322_s0] sm:$0xff]  ;;  %v27_v2 = vld [vmem:[%s322_s0 + $0x8] sm:$0xff]  ;;  %v36_v19 = vlaneseq  ;;  %vm58_vm4 = vcmask 523264  }
  0x14   :  { %216 = vset.pattern.permute.xlu0 %v268_v0  ;;  %v50_v3 = vld [vmem:[#allocation2] sm:$0xff]  ;;  %vm28_vm0 = vcmp.gt.s32.totalorder %v26_v1, 0  ;;  %vm30_vm1 = vcmp.gt.s32.totalorder %v27_v2, 0  ;;  %v51_v4 = vld [vmem:[#allocation2 + $0x8] sm:$0xff]  ;;  %v52_v5 = vld [vmem:[#allocation2 + $0x10] sm:$0xff]  ;;  %v269_v22 = vmov 0.0  }
  0x15   :  { %v53_v6 = vld [vmem:[#allocation2 + $0x18] sm:$0xff]  ;;  %v29_v7 = vsel %vm28_vm0, %v26_v1, 0  ;;  %v31_v8 = vsel %vm30_vm1, %v27_v2, 0  ;;  %v194_v9 = vpack.c.bf16 %v51_v4, %v50_v3  ;;  %v54_v11 = vld [vmem:[#allocation2 + $0x20] sm:$0xff]  ;;  %v55_v12 = vld [vmem:[#allocation2 + $0x28] sm:$0xff]  ;;  %v37_v20 = vand.u32 127, %v36_v19 }
  0x16   :  { %v198_v10 = vpack.c.bf16 %v53_v6, %v52_v5  ;;  %vm32_vm2 = vcmp.lt.s32.totalorder %v29_v7, 63  ;;  %vm34_vm3 = vcmp.lt.s32.totalorder %v31_v8, 63  ;;  %v202_v15 = vpack.c.bf16 %v55_v12, %v54_v11  ;;  %v56_v16 = vld [vmem:[#allocation2 + $0x30] sm:$0xff]  ;;  %v57_v17 = vld [vmem:[#allocation2 + $0x38] sm:$0xff]  ;;  %s270_s0 = smov [#allocation5]  }
  0x17   :  { %v33_v13 = vsel %vm32_vm2, %v29_v7, 63  ;;  %195 = vmatprep.subr.bf16.mxu0 %v194_v9  ;;  %v35_v14 = vsel %vm34_vm3, %v31_v8, 63  ;;  %v206_v18 = vpack.c.bf16 %v57_v17, %v56_v16  ;;  %s149_s1 = sshll.u32 %s270_s0, 4  ;;  %s150_s1 = int_to_ptr.vmem [resolvable:$true] %s149_s1 }
  0x18   :  { %39 = vperm.xlu0 %216, %v33_v13   ;;  %197 = vmatpush3.bf16.msra.mxu0 %v194_v9  ;;  %s239_s27 = scalar_lea.vmem %s150_s1, 256  ;;  %p244_p9 = scmp.lt.s32.totalorder %s150_s1, %s150_s1 }
  0x19   :  { %199 = vmatprep.subr.bf16.mxu0 %v198_v10  ;;  %p240_p8 = scmp.ne.s32.totalorder %s150_s1, %s239_s27  ;;  %p245_p10 = scmp.lt.s32.totalorder %s239_s27, %s239_s27 }
  0x1b   :  { %p246_p11 = por %p245_p10, %p244_p9 }
  0x1c   :  { %42 = vperm.xlu0 %216, %v35_v14   ;;  %201 = vmatpush3.bf16.msra.mxu0 %v198_v10 }
  0x1d   :  { %203 = vmatprep.subr.bf16.mxu0 %v202_v15  ;;  %p247_p12 = pnand %p246_p11, %p240_p8 }
  0x20   :  { %205 = vmatpush3.bf16.msra.mxu0 %v202_v15 }
  0x21   :  { %207 = vmatprep.subr.bf16.mxu0 %v206_v18 }
  0x24   :  { %209 = vmatpush3.bf16.msra.mxu0 %v206_v18 }
  0x97   :  { %v40_v21 = vpop.permute.xlu0 %39 }
  0x98   :  { %vm44_vm5 = vcmp.eq.s32.totalorder %v40_v21, %v37_v20 }
  0x99   :  { %v161_v23 = vsel %vm44_vm5, 1.0, %v269_v22 }
  0x9a   :  { %191 = vmatprep.mubr.msk.f32.mxu0 %vm58_vm4, %v161_v23 }
  0x9b   :  { %v43_v24 = vpop.permute.xlu0 %42 }
  0x9c   :  { %vm45_vm6 = vcmp.eq.s32.totalorder %v43_v24, %v37_v20 }
  0x9d   :  { %v162_v25 = vsel %vm45_vm6, 1.0, %v269_v22 }
  0x9e   :  { %192 = vmatmul.mubr.msk.f32.vlgmr.msra.gmra.mrb[0].mxu0 %vm58_vm4, %v162_v25 }
 0x171   :  { %v193_v26 = vpop.f32.mrb[0].mxu0 }
 0x172   :  { %v141_v27 = vmul.f32 11.313708, %v193_v26  ;;  %v131_v28 = vpop.f32.mrb[1].mxu0 }
 0x173   :  { %v140_v29 = vmul.f32 11.313708, %v131_v28 }
 0x174   :  { %143 = vst [vmem:[#allocation5 + $0x8] sm:$0xff] %v141_v27 }
 0x175   :  { %142 = vst [vmem:[#allocation5] sm:$0xff] %v140_v29 }
 0x176   :  { %250 = shalt.err (!%p247_p12)
}
 0x177   :  { %s251_s30 = scalar_lea.hbm %s324_s2, 256 }
 0x178   :  { %p252_p13 = scmp.ne.s32.totalorder %s324_s2, %s251_s30  ;;  %p255_p0 = scmp.lt.u32.totalorder %s251_s30, %s324_s2 }
 0x17a   :  { %p257_p1 = pnand %p255_p0, %p252_p13 }
 0x17c   :  { %260 = shalt.err (!%p257_p1)
}
 0x17d   :  { %155 = dma.vmem_to_hbm [thread:$0]  %s150_s1, 256, %s324_s2, [#allocation4], %s266_s19, %s266_s19, %s267_s20  }
 0x17e   :  { %263 = dma.done.wait [#allocation4], 256  }
 0x17f   :  { %264 = vsyncadd [#allocation4], 4294967040 }
 0x180   :  { %159 = vsyncpa [#allocation3], 1 }
 0x181   :  { %160 = vsyncpa [#allocation4], 1 }

</bundles_post_ra>
